<compile_context>
chip_gen: v7x
topology: tpu7x:2x2x1
jax: 0.10.0
libtpu: 0.0.40
codegen_flags: <defaults>
</compile_context>

<pallas_src>
import functools

import jax
import jax.numpy as jnp
from jax.experimental import pallas as pl
from jax.experimental.pallas import tpu as pltpu


def _round_up(x, m):
    return (x + m - 1) // m * m


# ----------------------------- Pallas kernels ------------------------------

def _mm_affine_kernel(a_ref, b_ref, s_ref, t_ref, o_ref, *, relu):
    acc = jnp.dot(a_ref[...], b_ref[...], preferred_element_type=jnp.float32)
    out = acc * s_ref[...] + t_ref[...]
    if relu:
        out = jnp.maximum(out, 0.0)
    o_ref[...] = out.astype(o_ref.dtype)


def matmul_affine(a, b, scale, bias, relu, out_dtype=jnp.bfloat16, tm_target=256):
    """maybe_relu((a @ b) * scale + bias).

    b/scale/bias must be pre-padded so N is a multiple of 128 (lane-dense stores).
    Full-K blocks (all K in this model fit VMEM comfortably).
    """
    M, K = a.shape
    K2, N = b.shape
    assert K == K2 and N % 128 == 0
    a = a.astype(jnp.bfloat16)

    # small-K layers are epilogue bound -> tn=128; big-K layers get 256 (MXU width).
    tn = 256 if (N % 256 == 0 and K >= 1024) else 128

    if M <= tm_target:
        Mp = _round_up(M, 8)
        tm = Mp
        # keep >=2 blocks along a parallel axis when possible (v7x has 2 TCs)
        if N // tn == 1 and Mp >= 16 and Mp % 16 == 0:
            tm = Mp // 2
    else:
        tm = tm_target
        Mp = _round_up(M, tm)
    if Mp != M:
        a = jnp.pad(a, ((0, Mp - M), (0, 0)))

    grid = (Mp // tm, N // tn)
    itm = jnp.dtype(out_dtype).itemsize
    need = 2 * (tm * K * 2 + K * tn * 2 + tm * tn * itm + 2 * tn * 4) + tm * tn * 8
    vmem = min(max(need + (4 << 20), 32 << 20), 64 << 20)
    flops = 2 * Mp * K * N
    bytes_accessed = 2 * (Mp * K + K * N) + 8 * N + Mp * N * itm

    out = pl.pallas_call(
        functools.partial(_mm_affine_kernel, relu=relu),
        out_shape=jax.ShapeDtypeStruct((Mp, N), out_dtype),
        grid_spec=pltpu.PrefetchScalarGridSpec(
            num_scalar_prefetch=0,
            grid=grid,
            in_specs=[
                pl.BlockSpec((tm, K), lambda i, j: (i, 0)),
                pl.BlockSpec((K, tn), lambda i, j: (0, j)),
                pl.BlockSpec((1, tn), lambda i, j: (0, j)),
                pl.BlockSpec((1, tn), lambda i, j: (0, j)),
            ],
            out_specs=pl.BlockSpec((tm, tn), lambda i, j: (i, j)),
        ),
        compiler_params=pltpu.CompilerParams(
            dimension_semantics=("parallel", "parallel"),
            vmem_limit_bytes=vmem),
        cost_estimate=pl.CostEstimate(flops=flops, transcendentals=0,
                                      bytes_accessed=bytes_accessed),
    )(a, b, scale, bias)
    if Mp != M:
        out = out[:M]
    return out


def _conv_kernel(xp_ref, w_ref, s_ref, t_ref, o_ref, patch_ref, *,
                 k, bh, wo, cin, relu):
    """Fused kxk conv (stride 1 over the pre-padded image) + affine (+ReLU).

    xp_ref : (Hp, Wp, cin)   whole padded image; resident across (j, hb) steps.
    w_ref  : (k*k*cin, tn)   weight tile, tap-major / ci-minor rows.
    s_ref/t_ref : (1, tn)    folded BN scale / bias.
    o_ref  : (bh*wo, tn)
    patch_ref : (bh*wo, k*k*cin) VMEM scratch — in-kernel im2col.
    """
    row0 = pl.multiple_of(pl.program_id(2) * bh, bh)
    for dy in range(k):
        rows = xp_ref[pl.ds(row0 + dy, bh), :, :]            # (bh, Wp, cin)
        for dx in range(k):
            t = dy * k + dx
            patch_ref[:, t * cin:(t + 1) * cin] = (
                rows[:, dx:dx + wo, :].reshape(bh * wo, cin))
    acc = jnp.dot(patch_ref[...], w_ref[...], preferred_element_type=jnp.float32)
    out = acc * s_ref[...] + t_ref[...]
    if relu:
        out = jnp.maximum(out, 0.0)
    o_ref[...] = out.astype(o_ref.dtype)


def _choose_bh(ho, wo, target=256):
    if ho * wo <= 2 * target:
        return ho
    bh = max(1, min(ho, target // max(wo, 1)))
    while bh > 1 and (ho % bh or (bh * wo) % 8):
        bh -= 1
    if ho % bh or ((bh * wo) % 8 and bh != ho):
        return ho
    return bh


def conv_fused(xp, w_mat, scale, bias, *, k, relu, ho, wo, out_dtype=jnp.bfloat16):
    """Fused kxk 'valid' conv over the pre-padded xp, + affine + optional ReLU.

    xp:    (N, Hp, Wp, cin) bf16 with Hp = ho+k-1, Wp = wo+k-1.
    w_mat: (k*k*cin, coutp) bf16, coutp % 128 == 0.
    Returns (N, ho, wo, coutp).
    """
    N, Hp, Wp, cin = xp.shape
    K, coutp = w_mat.shape
    assert K == k * k * cin and Hp == ho + k - 1 and Wp == wo + k - 1
    assert coutp % 128 == 0

    bh = _choose_bh(ho, wo)
    tm = bh * wo
    tn = 256 if (coutp % 256 == 0 and K >= 1024) else 128
    n_hb = ho // bh
    n_j = coutp // tn
    grid = (N, n_j, n_hb)

    itm = jnp.dtype(out_dtype).itemsize
    need = (2 * Hp * Wp * cin * 2 + 2 * K * tn * 2 + 2 * tm * tn * itm
            + tm * K * 2 + 4 * tn * 4 * 2 + tm * tn * 8)
    vmem = min(max(need + (4 << 20), 32 << 20), 64 << 20)
    flops = 2 * N * ho * wo * K * coutp
    bytes_accessed = (N * Hp * Wp * cin * 2 + K * coutp * 2
                      + N * ho * wo * coutp * itm)

    out = pl.pallas_call(
        functools.partial(_conv_kernel, k=k, bh=bh, wo=wo, cin=cin, relu=relu),
        out_shape=jax.ShapeDtypeStruct((N, ho * wo, coutp), out_dtype),
        grid_spec=pltpu.PrefetchScalarGridSpec(
            num_scalar_prefetch=0,
            grid=grid,
            in_specs=[
                pl.BlockSpec((None, Hp, Wp, cin), lambda n, j, hb: (n, 0, 0, 0)),
                pl.BlockSpec((K, tn), lambda n, j, hb: (0, j)),
                pl.BlockSpec((1, tn), lambda n, j, hb: (0, j)),
                pl.BlockSpec((1, tn), lambda n, j, hb: (0, j)),
            ],
            out_specs=pl.BlockSpec((None, tm, tn), lambda n, j, hb: (n, hb, j)),
            scratch_shapes=[pltpu.VMEM((tm, K), jnp.bfloat16)],
        ),
        compiler_params=pltpu.CompilerParams(
            dimension_semantics=("parallel", "parallel", "parallel"),
            vmem_limit_bytes=vmem),
        cost_estimate=pl.CostEstimate(flops=flops, transcendentals=0,
                                      bytes_accessed=bytes_accessed),
    )(xp, w_mat, scale, bias)
    return out.reshape(N, ho, wo, coutp)


def _maxpool_kernel(x_ref, o_ref, *, c):
    x = x_ref[...]                                    # (rb, 2, wo, 2c)
    m = jnp.maximum(x[..., :c], x[..., c:])           # fold the W-pair (lane dim)
    o_ref[...] = jnp.maximum(m[:, 0], m[:, 1])        # fold the H-pair


def maxpool2(x):
    """2x2 max pooling, stride 2.  x: NHWC (bf16)."""
    N, H, W, C = x.shape
    Ho, Wo = H // 2, W // 2
    rows = N * Ho
    xr = x.reshape(rows, 2, Wo, 2 * C)                # contiguous reshape
    bytes_per_row = 2 * Wo * 2 * C * x.dtype.itemsize
    budget = max(1, (2 << 20) // max(1, bytes_per_row))
    rb = rows
    for cand in range(min(rows, budget), 0, -1):
        if rows % cand == 0:
            rb = cand
            break
    if rows // rb == 1 and rows % 2 == 0 and rows >= 2:
        rb = rows // 2                                # give megacore 2 blocks
    out = pl.pallas_call(
        functools.partial(_maxpool_kernel, c=C),
        out_shape=jax.ShapeDtypeStruct((rows, Wo, C), x.dtype),
        grid=(rows // rb,),
        in_specs=[pl.BlockSpec((rb, 2, Wo, 2 * C), lambda i: (i, 0, 0, 0))],
        out_specs=pl.BlockSpec((rb, Wo, C), lambda i: (i, 0, 0)),
        compiler_params=pltpu.CompilerParams(dimension_semantics=("parallel",)),
    )(xr)
    return out.reshape(N, Ho, Wo, C)


# ----------------------------- glue -----------------------------------------

def _im2col_pre_padded(xp, k):
    """xp: already spatially padded NHWC -> (N*Ho*Wo, k*k*C), ordering (dy, dx, ci)."""
    N, Hp, Wp, C = xp.shape
    Ho, Wo = Hp - k + 1, Wp - k + 1
    cols = [xp[:, dy:dy + Ho, dx:dx + Wo, :] for dy in range(k) for dx in range(k)]
    patches = jnp.stack(cols, axis=3)
    return patches.reshape(N * Ho * Wo, k * k * C), (N, Ho, Wo)


def _convT_subpixel_weights(W):
    """W: (Cin, Cout, 4, 4) -> (4*Cin, 4*Cout) for the 4 sub-pixel phases."""
    Cin, Cout = W.shape[0], W.shape[1]
    idx = ((3, 1), (2, 0))
    blocks = []
    for r in (0, 1):
        for c in (0, 1):
            w_phase = jnp.stack(
                [jnp.stack([W[:, :, idx[r][dy], idx[c][dx]] for dx in (0, 1)],
                           axis=0)
                 for dy in (0, 1)], axis=0)           # (dy, dx, Cin, Cout)
            blocks.append(w_phase.reshape(4 * Cin, Cout))
    return jnp.concatenate(blocks, axis=1)            # (4*Cin, 4*Cout)


def conv3x3_block(x, layer, relu=True, pad_value=0.0):
    """Conv2d(3x3, s1, p1, no bias) + folded BN affine + optional ReLU."""
    N, H, W, cin = x.shape
    coutp = layer['w'].shape[1]
    cout = layer['cout']
    xp = jnp.pad(x, ((0, 0), (1, 1), (1, 1), (0, 0)),
                 constant_values=pad_value).astype(jnp.bfloat16)
    if cin > 1 and W % 8 == 0:
        out = conv_fused(xp, layer['w'], layer['s'], layer['t'],
                         k=3, relu=relu, ho=H, wo=W)
    else:
        # tiny / degenerate layers: XLA-side im2col (small) + generic matmul
        A, _ = _im2col_pre_padded(xp, 3)
        out = matmul_affine(A, layer['w'], layer['s'], layer['t'], relu)
        out = out.reshape(N, H, W, coutp)
    if coutp != cout:
        out = out[..., :cout]
    return out


def conv_transpose_block(x, layer):
    """ConvTranspose2d(k=4, s=2, p=1, bias) via the 2x2 sub-pixel decomposition."""
    N, H, W, cin = x.shape
    cout = layer['cout']
    xp = jnp.pad(x, ((0, 0), (1, 1), (1, 1), (0, 0))).astype(jnp.bfloat16)
    Hq, Wq = H + 1, W + 1
    if cin > 1 and Wq % 8 == 0:
        R = conv_fused(xp, layer['w'], layer['s'], layer['t'],
                       k=2, relu=False, ho=Hq, wo=Wq)
    else:
        A, _ = _im2col_pre_padded(xp, 2)
        R = matmul_affine(A, layer['w'], layer['s'], layer['t'], relu=False)
        R = R.reshape(N, Hq, Wq, 4 * cout)
    R = R.reshape(N, Hq, Wq, 2, 2, cout)
    rows = []
    for r in (0, 1):
        cols = [R[:, r:r + H, c:c + W, r, c, :] for c in (0, 1)]
        rows.append(jnp.stack(cols, axis=3))          # (N, H, W, 2, cout)
    out = jnp.stack(rows, axis=2)                     # (N, H, 2, W, 2, cout)
    return out.reshape(N, 2 * H, 2 * W, cout)


def conv1x1_block(x, layer):
    """Conv2d(1x1, s1, p0, with bias); output padded to 128 lanes and sliced back."""
    N, H, W, cin = x.shape
    cout = layer['cout']
    A = x.reshape(-1, cin)
    out = matmul_affine(A, layer['w'], layer['s'], layer['t'],
                        relu=False, out_dtype=jnp.float32)
    return out.reshape(N, H, W, -1)[..., :cout]


# ----------------------------- parameters ----------------------------------

def init_params(key):
    keys = iter(jax.random.split(key, 128))

    def conv_w(cout, cin, k):
        fan_in = cin * k * k
        return jax.random.normal(next(keys), (cout, cin, k, k),
                                 jnp.float32) * (2.0 / fan_in) ** 0.5

    def convT_w(cin, cout, k):
        fan_in = cin * k * k
        return jax.random.normal(next(keys), (cin, cout, k, k),
                                 jnp.float32) * (2.0 / fan_in) ** 0.5

    def bn(c):
        g = jax.random.uniform(next(keys), (c,), minval=0.5, maxval=1.5)
        be = jax.random.normal(next(keys), (c,)) * 0.1
        m = jax.random.normal(next(keys), (c,)) * 0.1
        v = jax.random.uniform(next(keys), (c,), minval=0.5, maxval=1.5)
        s = g / jnp.sqrt(v + 1e-5)
        t = be - m * s
        return (s.reshape(1, -1).astype(jnp.float32),
                t.reshape(1, -1).astype(jnp.float32))

    p = {}
    p['down'] = [(conv_w(co, ci, 3),) + bn(co)
                 for ci, co in [(1, 32), (32, 32), (32, 64),
                                (64, 128), (128, 256), (256, 256)]]
    p['dip1'] = [(conv_w(co, ci, 3),) + bn(co)
                 for ci, co in [(256, 256), (256, 256)]]
    p['dip2'] = [(conv_w(co, ci, 3),) + bn(co)
                 for ci, co in [(256, 512), (512, 512)]]
    p['dip2_up'] = (convT_w(512, 256, 4),
                    jax.random.normal(next(keys), (256,), jnp.float32) * 0.01)
    p['up1'] = (convT_w(512, 256, 4),
                jax.random.normal(next(keys), (256,), jnp.float32) * 0.01)
    p['final'] = [(conv_w(co, ci, 3),) + bn(co)
                  for ci, co in [(512, 256), (256, 256)]]
    p['final_1x1'] = (conv_w(2, 256, 1),
                      jax.random.normal(next(keys), (2,), jnp.float32) * 0.01)
    return p


def prepare_params(p):
    """One-time conversion into matmul-ready bf16 weights (tap-major, ci-minor K
    layout, Cout padded to 128-lane multiples), f32 scale/bias, convT sub-pixel
    weights, and the folded '1 - x' first layer."""
    def pad_vec(v, coutp):
        v = v.reshape(1, -1).astype(jnp.float32)
        if v.shape[1] != coutp:
            v = jnp.pad(v, ((0, 0), (0, coutp - v.shape[1])))
        return v

    def conv_layer(W, s, t, first=False):
        cout, cin = W.shape[0], W.shape[1]
        coutp = max(128, _round_up(cout, 128))
        if first:
            # fold x_in = 1 - x: conv(pad0(1-x)) = sum(W) - conv(pad1_ones(x))
            sumW = jnp.sum(W, axis=(1, 2, 3)).reshape(1, -1)
            s_eff, t_eff = -s, t + s * sumW
        else:
            s_eff, t_eff = s, t
        wm = jnp.transpose(W, (2, 3, 1, 0)).reshape(-1, cout)
        if coutp != cout:
            wm = jnp.pad(wm, ((0, 0), (0, coutp - cout)))
        return dict(w=wm.astype(jnp.bfloat16), s=pad_vec(s_eff, coutp),
                    t=pad_vec(t_eff, coutp), cout=cout, cin=cin)

    def convT_layer(W, b):
        cin, cout = W.shape[0], W.shape[1]
        wm = _convT_subpixel_weights(W).astype(jnp.bfloat16)     # (4*cin, 4*cout)
        bias = jnp.tile(b.reshape(1, -1).astype(jnp.float32), (1, 4))
        return dict(w=wm, s=jnp.ones((1, 4 * cout), jnp.float32),
                    t=bias, cout=cout, cin=cin)

    q = {}
    q['down'] = [conv_layer(*p['down'][0], first=True)] + [
        conv_layer(*l) for l in p['down'][1:]]
    q['dip1'] = [conv_layer(*l) for l in p['dip1']]
    q['dip2'] = [conv_layer(*l) for l in p['dip2']]
    q['dip2_up'] = convT_layer(*p['dip2_up'])
    q['up1'] = convT_layer(*p['up1'])
    q['final'] = [conv_layer(*l) for l in p['final']]
    Wf, bf = p['final_1x1']
    cout, cin = Wf.shape[0], Wf.shape[1]
    coutp = 128
    wm = jnp.pad(Wf.reshape(cout, cin).T, ((0, 0), (0, coutp - cout)))
    q['final_1x1'] = dict(w=wm.astype(jnp.bfloat16),
                          s=jnp.ones((1, coutp), jnp.float32),
                          t=pad_vec(bf, coutp), cout=cout, cin=cin)
    return q


# ----------------------------- forward --------------------------------------

def forward(x_nchw, q):
    x = jnp.transpose(x_nchw, (0, 2, 3, 1)).astype(jnp.bfloat16)   # -> NHWC bf16

    # Downscale ('1 - x' folded into the first layer: ones padding + negated scale)
    h = conv3x3_block(x, q['down'][0], pad_value=1.0)
    for li in range(1, len(q['down'])):
        h = conv3x3_block(h, q['down'][li])
        if li in (1, 3):
            h = maxpool2(h)
    down = h                                                      # (N, H/4, W/4, 256)

    # Dip1
    h = maxpool2(down)
    for layer in q['dip1']:
        h = conv3x3_block(h, layer)
    dip1 = h                                                      # (N, H/8, W/8, 256)

    # Dip2
    h = maxpool2(dip1)
    for layer in q['dip2']:
        h = conv3x3_block(h, layer)
    dip2 = conv_transpose_block(h, q['dip2_up'])                  # (N, H/8, W/8, 256)

    # Up1
    up1 = conv_transpose_block(jnp.concatenate([dip2, dip1], axis=-1), q['up1'])

    # Final
    h = jnp.concatenate([down, up1], axis=-1)                     # (N, H/4, W/4, 512)
    for layer in q['final']:
        h = conv3x3_block(h, layer)
    out = conv1x1_block(h, q['final_1x1'])                        # (N, H/4, W/4, 2) f32

    return jnp.transpose(out, (0, 3, 1, 2))                       # back to NCHW


if __name__ == "__main__":
    key = jax.random.PRNGKey(0)
    kx, kp = jax.random.split(key)

    # input: NCHW, 1 channel; spatial must be divisible by 16 (4 pooling levels)
    x = jax.random.uniform(kx, (2, 1, 32, 32), jnp.float32)
    params = init_params(kp)
    prep = prepare_params(params)

    # cross-check the fused in-kernel-im2col conv against the im2col+matmul path
    layer = prep['down'][1]
    xt = jax.random.normal(jax.random.PRNGKey(1), (2, 16, 16, layer['cin']),
                           jnp.bfloat16)
    xtp = jnp.pad(xt, ((0, 0), (1, 1), (1, 1), (0, 0)))
    A, _ = _im2col_pre_padded(xtp, 3)
    ref = matmul_affine(A, layer['w'], layer['s'], layer['t'], True)
    ref = ref.reshape(2, 16, 16, -1).astype(jnp.float32)
    got = conv_fused(xtp, layer['w'], layer['s'], layer['t'],
                     k=3, relu=True, ho=16, wo=16).astype(jnp.float32)
    assert bool(jnp.allclose(ref, got, atol=5e-2, rtol=5e-2))

    fwd = jax.jit(lambda xin: forward(xin, prep))   # prep is a closure constant
    out = jax.block_until_ready(fwd(x))

    assert out.shape == (2, 2, 8, 8), out.shape
    assert bool(jnp.all(jnp.isfinite(out)))
    print("KERNEL_OK")
</pallas_src>

<mosaic_0001>
module attributes {stable_mosaic.version = 11 : i64} {
  func.func @_mm_affine_kernel(%arg0: i32, %arg1: i32, %arg2: memref<256x288xbf16, #tpu.memory_space<vmem>>, %arg3: memref<288x128xbf16, #tpu.memory_space<vmem>>, %arg4: memref<1x128xf32, #tpu.memory_space<vmem>>, %arg5: memref<1x128xf32, #tpu.memory_space<vmem>>, %arg6: memref<256x128xbf16, #tpu.memory_space<vmem>>) attributes {dimension_semantics = [#tpu.dimension_semantics<parallel>, #tpu.dimension_semantics<parallel>], iteration_bounds = array<i64: 2, 1>, scalar_prefetch = 0 : i64, scratch_operands = 0 : i64, tpu.core_type = #tpu.core_type<tc>, window_params = [{transform_indices = @transform_0, window_bounds = array<i64: 256, 288>}, {transform_indices = @transform_1, window_bounds = array<i64: 288, 128>}, {transform_indices = @transform_2, window_bounds = array<i64: 1, 128>}, {transform_indices = @transform_3, window_bounds = array<i64: 1, 128>}, {transform_indices = @transform_4, window_bounds = array<i64: 256, 128>}]} {
    %c0 = arith.constant 0 : index
    %c0_0 = arith.constant 0 : index
    %0 = vector.load %arg2[%c0, %c0_0] : memref<256x288xbf16, #tpu.memory_space<vmem>>, vector<256x288xbf16>
    %c0_1 = arith.constant 0 : index
    %c0_2 = arith.constant 0 : index
    %1 = vector.load %arg3[%c0_1, %c0_2] : memref<288x128xbf16, #tpu.memory_space<vmem>>, vector<288x128xbf16>
    %cst = arith.constant dense<0.000000e+00> : vector<256x128xf32>
    %2 = tpu.matmul %0, %1, %cst {dimension_numbers = #tpu.dot_dimension_numbers<[1], [0], [0], [1], [0, 0, 1, 1], [], []>} : vector<256x288xbf16>, vector<288x128xbf16>, vector<256x128xf32> -> vector<256x128xf32>
    %c0_3 = arith.constant 0 : index
    %c0_4 = arith.constant 0 : index
    %3 = vector.load %arg4[%c0_3, %c0_4] : memref<1x128xf32, #tpu.memory_space<vmem>>, vector<1x128xf32>
    %4 = vector.broadcast %3 : vector<1x128xf32> to vector<256x128xf32>
    %5 = arith.mulf %2, %4 : vector<256x128xf32>
    %c0_5 = arith.constant 0 : index
    %c0_6 = arith.constant 0 : index
    %6 = vector.load %arg5[%c0_5, %c0_6] : memref<1x128xf32, #tpu.memory_space<vmem>>, vector<1x128xf32>
    %7 = vector.broadcast %6 : vector<1x128xf32> to vector<256x128xf32>
    %8 = arith.addf %5, %7 : vector<256x128xf32>
    %cst_7 = arith.constant 0.000000e+00 : f32
    %9 = vector.broadcast %cst_7 : f32 to vector<256x128xf32>
    %10 = arith.maximumf %8, %9 : vector<256x128xf32>
    %11 = arith.truncf %10 : vector<256x128xf32> to vector<256x128xbf16>
    %c0_8 = arith.constant 0 : index
    %c0_9 = arith.constant 0 : index
    %12 = vector.load %arg6[%c0_8, %c0_9] : memref<256x128xbf16, #tpu.memory_space<vmem>>, vector<256x128xbf16>
    tpu.vector_store %arg6[%c0_8, %c0_9], %11 {strides = array<i32>} : memref<256x128xbf16, #tpu.memory_space<vmem>>, vector<256x128xbf16>,
    return
  }
  func.func @transform_0(%arg0: i32, %arg1: i32) -> (i32, i32) {
    %c0_i32 = arith.constant 0 : i32
    %c0_i32_0 = arith.constant 0 : i32
    return %arg0, %c0_i32 : i32, i32
  }
  func.func @transform_1(%arg0: i32, %arg1: i32) -> (i32, i32) {
    %c0_i32 = arith.constant 0 : i32
    %c0_i32_0 = arith.constant 0 : i32
    return %c0_i32, %arg1 : i32, i32
  }
  func.func @transform_2(%arg0: i32, %arg1: i32) -> (i32, i32) {
    %c0_i32 = arith.constant 0 : i32
    %c0_i32_0 = arith.constant 0 : i32
    return %c0_i32, %arg1 : i32, i32
  }
  func.func @transform_3(%arg0: i32, %arg1: i32) -> (i32, i32) {
    %c0_i32 = arith.constant 0 : i32
    %c0_i32_0 = arith.constant 0 : i32
    return %c0_i32, %arg1 : i32, i32
  }
  func.func @transform_4(%arg0: i32, %arg1: i32) -> (i32, i32) {
    %c0_i32 = arith.constant 0 : i32
    return %arg0, %arg1 : i32, i32
  }
}

</mosaic_0001>

<bundles_post_ra>
// kernel: tpu_custom_call.1
= control target key start
LH: loop header
LB: loop body
LE: loop exit
PB: predicated region body
PF: predicated region fallthrough
CT: control target
= control target key end

     0   :  { %9 = vsyncpa [#allocation3], 0  ;;  %s2528_s0 = inlined_call_operand.vmem [shape: bf16[512,288], index: 0, kind: input, shape index: {}]   ;;  %s2529_s1 = inlined_call_operand.vmem [shape: bf16[288,128], index: 1, kind: input, shape index: {}]   ;;  %s2530_s2 = inlined_call_operand.vmem [shape: f32[1,128], index: 2, kind: input, shape index: {}]   ;;  %s2531_s3 = inlined_call_operand.vmem [shape: f32[1,128], index: 3, kind: input, shape index: {}]   ;;  %s2532_s4 = inlined_call_operand.hbm [shape: bf16[512,128], index: 4, kind: output, shape index: {}]  }
   0x1   :  { %11 = vsyncpa [#allocation3 + $0x1], 0  ;;  %s2167_s15 = smov 0   ;;  %s2169_s16 = smov 0  }
   0x2   :  { %s2171_s17 = smov 0   ;;  %s2173_s18 = smov 0  }
   0x3   :  { %s2175_s19 = smov 0   ;;  %s2177_s20 = smov 0  }
   0x4 LB: > { %s1477_s21 = sadd.s32 4294967295, %s2137_s20   ;;  %s1478_s22 = sadd.s32 4294967294, %s2137_s20   ;;  %s2137_s20 = sphi %s2177_s20, %s17_s20   ;;  %s2133_s19 = sphi %s2175_s19, %s2539_s19   ;;  %s2129_s18 = sphi %s2173_s18, %s2538_s18   ;;  %s2125_s17 = sphi %s2171_s17, %s2537_s17   ;;  %s2121_s16 = sphi %s2169_s16, %s2536_s16   ;;  %s2117_s15 = sphi %s2167_s15, %s2535_s15  }
   0x5   : > { %s29_s23 = sadd.s32 1, %s2133_s19  ;;  %s142_s24 = sadd.s32 1, %s2125_s17 }
   0x6   : > { %p31_p0 = scmp.ge.s32.totalorder %s29_s23, 2  ;;  %p152_p1 = scmp.ne.s32.totalorder %s2125_s17, %s2121_s16 }
   0x7   : > { %p153_p2 = scmp.eq.s32.totalorder %s1477_s21, 1  ;;  %p158_p3 = scmp.ne.s32.totalorder %s2121_s16, %s2117_s15 }
   0x8   : > { %s2541_s23 = smov (%p31_p0, %s29_s23), 0  ;;  %p159_p5 = scmp.eq.s32.totalorder %s1478_s22, 1 }
   0x9   : > { %p2207_p4 = por %p153_p2, %p152_p1  ;;  %s137_s26 = ssub.s32 %s2133_s19, %s2541_s23 }
   0xa   : > { %p1484_p6 = scmp.ge.s32.totalorder %s2137_s20, 1  ;;  %p140_p7 = scmp.eq.s32.totalorder %s137_s26, 0 }
   0xb   : > { %p2214_p8 = por %p159_p5, %p158_p3  ;;  %p206_p9 = scmp.lt.s32.totalorder %s2137_s20, 3 }
   0xc   : > { %s2220_s28 = scalar_select %p140_p7, %s2125_s17, %s142_s24  }
   0xd   : > { %p207_p10 = pnand %p1484_p6, %p206_p9 }
   0xe   : > { %v1977_v0 = vld [vmem:[%s2529_s1 + $0x40] sm:$0xff] (!%p207_p10)   ;;  %s1486_s5 = sshll.u32 (!%p207_p10), %s2129_s18, 5  ;;  %v1979_v2 = vld [vmem:[%s2529_s1 + $0x48] sm:$0xff] (!%p207_p10)   ;;  %v1981_v4 = vld [vmem:[%s2529_s1 + $0x50] sm:$0xff] (!%p207_p10)   ;;  %vm710_vm0 = vcmask (!%p207_p10), 261120   ;;  %s240_s22 = sand.u32 (!%p207_p10), 1, %s2121_s16  }
   0xf   : > { %210 = sbr.rel (%p207_p10) target bundleno = 377 (0x179), region = 36  ;;  %v1978_v1 = vld [vmem:[%s2529_s1] sm:$0xff] (!%p207_p10)   ;;  %1737 = vmatprep.subr.bf16.mxu0 (!%p207_p10), %v1977_v0  ;;  %1903 = vmatprep.subr.bf16.mxu1 (!%p207_p10), %v1977_v0  ;;  %p244_p11 = scmp.lt.s32.totalorder (!%p207_p10), %s1486_s5, 63  ;;  %v1980_v3 = vld [vmem:[%s2529_s1 + $0x8] sm:$0xff] (!%p207_p10)   ;;  %v1982_v5 = vld [vmem:[%s2529_s1 + $0x10] sm:$0xff] (!%p207_p10)  }
  0x10   : > { %1738 = vmatpush3.bf16.msra.mxu0 (!%p207_p10), %v1978_v1  ;;  %1911 = vmatpush3.bf16.msra.mxu1 (!%p207_p10), %v1978_v1  ;;  %v1983_v6 = vld [vmem:[%s2529_s1 + $0x58] sm:$0xff] (!%p207_p10)   ;;  %v1985_v8 = vld [vmem:[%s2529_s1 + $0x60] sm:$0xff] (!%p207_p10)   ;;  %v1987_v10 = vld [vmem:[%s2529_s1 + $0x68] sm:$0xff] (!%p207_p10)   ;;  %s1485_s24 = sshll.u32 (!%p207_p10), %s240_s22, 7  ;;  %s1641_s29 = sshll.u32 (!%p207_p10), %s2129_s18, 11 }
  0x11   : > { %1739 = vmatprep.subr.bf16.mxu0 (!%p207_p10), %v1979_v2  ;;  %1904 = vmatprep.subr.bf16.mxu1 (!%p207_p10), %v1979_v2  ;;  %v1984_v7 = vld [vmem:[%s2529_s1 + $0x18] sm:$0xff] (!%p207_p10)   ;;  %v1986_v9 = vld [vmem:[%s2529_s1 + $0x20] sm:$0xff] (!%p207_p10)   ;;  %v1988_v13 = vld [vmem:[%s2529_s1 + $0x28] sm:$0xff] (!%p207_p10)   ;;  %s2474_s8 = scalar_lea.hbm (!%p207_p10), %s2532_s4, %s1641_s29  ;;  %s2482_s18 = scalar_lea.sflag (!%p207_p10), [#allocation3], %s240_s22 }
  0x12   : > { %v1989_v14 = vld [vmem:[%s2529_s1 + $0x70] sm:$0xff] (!%p207_p10)   ;;  %v1991_v16 = vld [vmem:[%s2529_s1 + $0x78] sm:$0xff] (!%p207_p10)   ;;  %v1999_v18 = vld [vmem:[%s2529_s1 + $0x80] sm:$0xff] (!%p207_p10)  }
  0x13   : > { %v1990_v15 = vld [vmem:[%s2529_s1 + $0x30] sm:$0xff] (!%p207_p10)   ;;  %v1992_v17 = vld [vmem:[%s2529_s1 + $0x38] sm:$0xff] (!%p207_p10)   ;;  %v2012_v23 = vld [vmem:[%s2529_s1 + $0x88] sm:$0xff] (!%p207_p10)  }
  0x14   : > { %1740 = vmatpush3.bf16.msra.mxu0 (!%p207_p10), %v1980_v3  ;;  %1912 = vmatpush3.bf16.msra.mxu1 (!%p207_p10), %v1980_v3 }
  0x15   : > { %1741 = vmatprep.subr.bf16.mxu0 (!%p207_p10), %v1981_v4  ;;  %1905 = vmatprep.subr.bf16.mxu1 (!%p207_p10), %v1981_v4 }
  0x16   : > { %s2543_s5 = smov (!%p244_p11, %s1486_s5), 63 }
  0x17   : > { %s1919_s26 = smul.u32 12, %s2543_s5  ;;  %s2139_s5 = smov [#allocation2]  }
  0x18   : > { %1742 = vmatpush3.bf16.msra.mxu0 %v1982_v5  ;;  %1913 = vmatpush3.bf16.msra.mxu1 %v1982_v5  ;;  %s2063_s11 = sshll.u32 %s2139_s5, 4  ;;  %s2064_s11 = int_to_ptr.vmem [resolvable:$false] %s2063_s11 }
  0x19   : > { %1743 = vmatprep.subr.bf16.mxu0 %v1983_v6  ;;  %1906 = vmatprep.subr.bf16.mxu1 %v1983_v6  ;;  %s2253_s10 = scalar_lea.vmem %s2528_s0, %s1919_s26  ;;  %s2385_s26 = scalar_lea.vmem [#allocation2], %s1485_s24 }
  0x1a   : > { %v1995_v11 = vld [vmem:[%s2253_s10 + $0x4] ss:$12 sps:$4 sm:$0xff]   ;;  %v1993_v19 = vld [vmem:[%s2253_s10] ss:$12 sps:$4 sm:$0xff]   ;;  %v2000_v21 = vld [vmem:[%s2253_s10 + $0x1c] ss:$12 sps:$4 sm:$0xff]  }
  0x1b   : > { %v1998_v12 = vld [vmem:[%s2253_s10 + $0x124] ss:$12 sps:$4 sm:$0xff]   ;;  %791 = vmatprep.mubr.bf16.mxu0 %v1995_v11  ;;  %v1996_v20 = vld [vmem:[%s2253_s10 + $0x120] ss:$12 sps:$4 sm:$0xff]   ;;  %v2002_v22 = vld [vmem:[%s2253_s10 + $0x13c] ss:$12 sps:$4 sm:$0xff]  }
  0x1c   : > { %1744 = vmatpush3.bf16.msra.mxu0 %v1984_v7  ;;  %1914 = vmatpush3.bf16.msra.mxu1 %v1984_v7  ;;  %v2004_v24 = vld [vmem:[%s2253_s10 + $0x18] ss:$12 sps:$4 sm:$0xff]   ;;  %v2006_v26 = vld [vmem:[%s2253_s10 + $0x34] ss:$12 sps:$4 sm:$0xff]   ;;  %v2010_v28 = vld [vmem:[%s2253_s10 + $0x30] ss:$12 sps:$4 sm:$0xff]  }
  0x1d   : > { %1745 = vmatprep.subr.bf16.mxu0 %v1985_v8  ;;  %1907 = vmatprep.subr.bf16.mxu1 %v1985_v8  ;;  %v2005_v25 = vld [vmem:[%s2253_s10 + $0x138] ss:$12 sps:$4 sm:$0xff]   ;;  %v2008_v27 = vld [vmem:[%s2253_s10 + $0x154] ss:$12 sps:$4 sm:$0xff]   ;;  %v2011_v29 = vld [vmem:[%s2253_s10 + $0x150] ss:$12 sps:$4 sm:$0xff]  }
  0x1e   : > { %887 = vmatprep.mubr.bf16.mxu1 %v1998_v12  ;;  %v2013_v30 = vld [vmem:[%s2253_s10 + $0x4c] ss:$12 sps:$4 sm:$0xff]   ;;  %v2017_v32 = vld [vmem:[%s2253_s10 + $0x48] ss:$12 sps:$4 sm:$0xff]   ;;  %v2019_v34 = vld [vmem:[%s2253_s10 + $0x64] ss:$12 sps:$4 sm:$0xff]  }
  0x1f   : > { %v2015_v31 = vld [vmem:[%s2253_s10 + $0x16c] ss:$12 sps:$4 sm:$0xff]   ;;  %v2018_v33 = vld [vmem:[%s2253_s10 + $0x168] ss:$12 sps:$4 sm:$0xff]   ;;  %v2028_v41 = vld [vmem:[%s2253_s10 + $0x50] ss:$12 sps:$4 sm:$0xff]  }
  0x20   : > { %1746 = vmatpush3.bf16.msra.mxu0 %v1986_v9  ;;  %1915 = vmatpush3.bf16.msra.mxu1 %v1986_v9  ;;  %v2021_v35 = vld [vmem:[%s2253_s10 + $0x8] ss:$12 sps:$4 sm:$0xff]   ;;  %v2022_v36 = vld [vmem:[%s2253_s10 + $0x60] ss:$12 sps:$4 sm:$0xff]   ;;  %v2026_v39 = vld [vmem:[%s2253_s10 + $0x38] ss:$12 sps:$4 sm:$0xff]  }
  0x21   : > { %1747 = vmatprep.subr.bf16.mxu0 %v1987_v10  ;;  %1908 = vmatprep.subr.bf16.mxu1 %v1987_v10  ;;  %v2023_v37 = vld [vmem:[%s2253_s10 + $0x20] ss:$12 sps:$4 sm:$0xff]   ;;  %v2024_v38 = vld [vmem:[%s2253_s10 + $0x7c] ss:$12 sps:$4 sm:$0xff]   ;;  %v2027_v40 = vld [vmem:[%s2253_s10 + $0x78] ss:$12 sps:$4 sm:$0xff]  }
  0x22   : > { %v2029_v42 = vld [vmem:[%s2253_s10 + $0x94] ss:$12 sps:$4 sm:$0xff]   ;;  %v2032_v44 = vld [vmem:[%s2253_s10 + $0x90] ss:$12 sps:$4 sm:$0xff]   ;;  %v2034_v46 = vld [vmem:[%s2253_s10 + $0xac] ss:$12 sps:$4 sm:$0xff]  }
  0x23   : > { %v2031_v43 = vld [vmem:[%s2253_s10 + $0x68] ss:$12 sps:$4 sm:$0xff]   ;;  %v2033_v45 = vld [vmem:[%s2253_s10 + $0x80] ss:$12 sps:$4 sm:$0xff]   ;;  %v2036_v47 = vld [vmem:[%s2253_s10 + $0x98] ss:$12 sps:$4 sm:$0xff]  }
  0x24   : > { %1748 = vmatpush3.bf16.msra.mxu0 %v1988_v13  ;;  %1916 = vmatpush3.bf16.msra.mxu1 %v1988_v13  ;;  %v2037_v48 = vld [vmem:[%s2253_s10 + $0xa8] ss:$12 sps:$4 sm:$0xff]   ;;  %v2038_v49 = vld [vmem:[%s2253_s10 + $0xb0] ss:$12 sps:$4 sm:$0xff]   ;;  %v2042_v52 = vld [vmem:[%s2253_s10 + $0xc0] ss:$12 sps:$4 sm:$0xff]  }
  0x25   : > { %1749 = vmatprep.subr.bf16.mxu0 %v1989_v14  ;;  %1909 = vmatprep.subr.bf16.mxu1 %v1989_v14  ;;  %v2039_v50 = vld [vmem:[%s2253_s10 + $0xc4] ss:$12 sps:$4 sm:$0xff]   ;;  %v2041_v51 = vld [vmem:[%s2253_s10 + $0xc8] ss:$12 sps:$4 sm:$0xff]   ;;  %v2043_v53 = vld [vmem:[%s2253_s10 + $0xe0] ss:$12 sps:$4 sm:$0xff]  }
  0x26   : > { %v2044_v54 = vld [vmem:[%s2253_s10 + $0xdc] ss:$12 sps:$4 sm:$0xff]   ;;  %v2046_v55 = vld [vmem:[%s2253_s10 + $0xf8] ss:$12 sps:$4 sm:$0xff]   ;;  %v2049_v58 = vld [vmem:[%s2253_s10 + $0xf4] ss:$12 sps:$4 sm:$0xff]  }
  0x27   : > { %v2047_v56 = vld [vmem:[%s2253_s10 + $0xd8] ss:$12 sps:$4 sm:$0xff]   ;;  %v2048_v57 = vld [vmem:[%s2253_s10 + $0x110] ss:$12 sps:$4 sm:$0xff]   ;;  %v2051_v59 = vld [vmem:[%s2253_s10 + $0x128] ss:$12 sps:$4 sm:$0xff]  }
  0x28   : > { %1750 = vmatpush3.bf16.msra.mxu0 %v1990_v15  ;;  %1917 = vmatpush3.bf16.msra.mxu1 %v1990_v15  ;;  %v2052_v60 = vld [vmem:[%s2253_s10 + $0xf0] ss:$12 sps:$4 sm:$0xff]   ;;  %v2053_v61 = vld [vmem:[%s2253_s10 + $0x140] ss:$12 sps:$4 sm:$0xff]   ;;  %v2056_v63 = vld [vmem:[%s2253_s10 + $0x158] ss:$12 sps:$4 sm:$0xff]  }
  0x29   : > { %1751 = vmatprep.subr.bf16.mxu0 %v1991_v16  ;;  %1910 = vmatprep.subr.bf16.mxu1 %v1991_v16  ;;  %v2054_v62 = vld [vmem:[%s2253_s10 + $0x10c] ss:$12 sps:$4 sm:$0xff]   ;;  %v2057_v0 = vld [vmem:[%s2253_s10 + $0x108] ss:$12 sps:$4 sm:$0xff]   ;;  %v2058_v1 = vld [vmem:[%s2253_s10 + $0x170] ss:$12 sps:$4 sm:$0xff]  }
  0x2a   : > { %s1366_s30 = sshll.u32 %s2385_s26, 4  ;;  %s2065_s12 = scalar_lea.vmem %s2064_s11, 4096  ;;  %s2476_s30 = int_to_ptr.vmem [resolvable:$true] %s1366_s30 }
  0x2b   : > { %s2059_s9 = scalar_lea.vmem %s2476_s30, 2048  ;;  %p2066_p1 = scmp.lt.s32.totalorder %s2476_s30, %s2064_s11 }
  0x2c   : > { %1752 = vmatpush3.bf16.msra.mxu0 %v1992_v17  ;;  %1918 = vmatpush3.bf16.msra.mxu1 %v1992_v17  ;;  %p2060_p12 = scmp.ne.s32.totalorder %s2476_s30, %s2059_s9  ;;  %p2067_p2 = scmp.lt.s32.totalorder %s2065_s12, %s2059_s9 }
  0x2d   : > { %1867 = vmatprep.subr.bf16.mxu1 %v1999_v18 }
  0x2e   : > { %p2061_p13 = pnand %p2060_p12, %p2207_p4  ;;  %p2068_p3 = por %p2067_p2, %p2066_p1 }
  0x2f   : > { %792 = vmatmul.mubr.bf16.vlgmr.msra.gmra.mrb[0].mxu0 %v1993_v19  ;;  %888 = vmatmul.mubr.bf16.vlgmr.msra.gmra.mrb[0].mxu1 %v1996_v20 }
  0x30   : > { %1868 = vmatpush3.bf16.msra.mxu1 %v1999_v18  ;;  %799 = vmatprep.mubr.bf16.mxu0 %v2000_v21  ;;  %p2062_p0 = pneg %p2061_p13 }
  0x31   : > { %895 = vmatprep.mubr.bf16.mxu1 %v2002_v22  ;;  %1869 = vmatprep.subr.bf16.mxu1 %v2012_v23 }
  0x32   : > { %p2069_p5 = pnand %p2068_p3, %p2062_p0 }
  0x34   : > { %1870 = vmatpush3.bf16.msra.mxu1 %v2012_v23 }
  0x37   : > { %800 = vmatmul.mubr.bf16.gmra.mrb[4].mxu0 %v2004_v24  ;;  %896 = vmatmul.mubr.bf16.gmra.mrb[4].mxu1 %v2005_v25 }
  0x38   : > { %807 = vmatprep.mubr.bf16.mxu0 %v2006_v26  ;;  %903 = vmatprep.mubr.bf16.mxu1 %v2008_v27 }
  0x3f   : > { %808 = vmatmul.mubr.bf16.gmra.mrb[8].mxu0 %v2010_v28  ;;  %904 = vmatmul.mubr.bf16.gmra.mrb[8].mxu1 %v2011_v29 }
  0x40   : > { %815 = vmatprep.mubr.bf16.mxu0 %v2013_v30  ;;  %911 = vmatprep.mubr.bf16.mxu1 %v2015_v31 }
  0x47   : > { %816 = vmatmul.mubr.bf16.gmra.mrb[12].mxu0 %v2017_v32  ;;  %912 = vmatmul.mubr.bf16.gmra.mrb[12].mxu1 %v2018_v33 }
  0x48   : > { %823 = vmatprep.mubr.bf16.mxu0 %v2019_v34  ;;  %1871 = vmatprep.mubr.msk.bf16.mxu1 %vm710_vm0, %v2021_v35 }
  0x4f   : > { %824 = vmatmul.mubr.bf16.gmra.mrb[16].mxu0 %v2022_v36  ;;  %1872 = vmatmul.mubr.msk.bf16.vlgmr.msra.gmra.mrb[16].mxu1 %vm710_vm0, %v2023_v37 }
  0x50   : > { %831 = vmatprep.mubr.bf16.mxu0 %v2024_v38  ;;  %1875 = vmatprep.mubr.msk.bf16.mxu1 %vm710_vm0, %v2026_v39 }
  0x57   : > { %832 = vmatmul.mubr.bf16.gmra.mrb[20].mxu0 %v2027_v40  ;;  %1876 = vmatmul.mubr.msk.bf16.gmra.mrb[20].mxu1 %vm710_vm0, %v2028_v41 }
  0x58   : > { %839 = vmatprep.mubr.bf16.mxu0 %v2029_v42  ;;  %1879 = vmatprep.mubr.msk.bf16.mxu1 %vm710_vm0, %v2031_v43 }
  0x5f   : > { %840 = vmatmul.mubr.bf16.gmra.mrb[24].mxu0 %v2032_v44  ;;  %1880 = vmatmul.mubr.msk.bf16.gmra.mrb[24].mxu1 %vm710_vm0, %v2033_v45 }
  0x60   : > { %847 = vmatprep.mubr.bf16.mxu0 %v2034_v46  ;;  %1883 = vmatprep.mubr.msk.bf16.mxu1 %vm710_vm0, %v2036_v47 }
  0x67   : > { %848 = vmatmul.mubr.bf16.gmra.mrb[28].mxu0 %v2037_v48  ;;  %1884 = vmatmul.mubr.msk.bf16.gmra.mrb[28].mxu1 %vm710_vm0, %v2038_v49 }
  0x68   : > { %855 = vmatprep.mubr.bf16.mxu0 %v2039_v50  ;;  %1887 = vmatprep.mubr.msk.bf16.mxu1 %vm710_vm0, %v2041_v51 }
  0x6f   : > { %856 = vmatmul.mubr.bf16.gmra.mrb[32].mxu0 %v2042_v52  ;;  %1888 = vmatmul.mubr.msk.bf16.gmra.mrb[32].mxu1 %vm710_vm0, %v2043_v53  ;;  %v2365_v52 = vld [vmem:[%s2530_s2] ss:$0 sm:$0xff] }
  0x70   : > { %863 = vmatprep.mubr.bf16.mxu0 %v2044_v54  ;;  %1891 = vmatprep.mubr.msk.bf16.mxu1 %vm710_vm0, %v2046_v55 }
  0x77   : > { %864 = vmatmul.mubr.bf16.gmra.mrb[36].mxu0 %v2047_v56  ;;  %1892 = vmatmul.mubr.msk.bf16.gmra.mrb[36].mxu1 %vm710_vm0, %v2048_v57  ;;  %v2370_v56 = vld [vmem:[%s2531_s3] ss:$0 sm:$0xff] }
  0x78   : > { %871 = vmatprep.mubr.bf16.mxu0 %v2049_v58  ;;  %1895 = vmatprep.mubr.msk.bf16.mxu1 %vm710_vm0, %v2051_v59 }
  0x7f   : > { %872 = vmatmul.mubr.bf16.gmra.mrb[40].mxu0 %v2052_v60  ;;  %1896 = vmatmul.mubr.msk.bf16.gmra.mrb[40].mxu1 %vm710_vm0, %v2053_v61 }
  0x80   : > { %879 = vmatprep.mubr.bf16.mxu0 %v2054_v62  ;;  %1899 = vmatprep.mubr.msk.bf16.mxu1 %vm710_vm0, %v2056_v63 }
  0x87   : > { %880 = vmatmul.mubr.bf16.gmra.mrb[44].mxu0 %v2057_v0  ;;  %1900 = vmatmul.mubr.msk.bf16.gmra.mrb[44].mxu1 %vm710_vm0, %v2058_v1 }
 0x102   : > { %v1753_v2 = vpop.f32.mrb[0].mxu0  ;;  %v1825_v3 = vpop.f32.mrb[0].mxu1 }
 0x103   : > { %v1754_v4 = vpop.f32.mrb[1].mxu0  ;;  %v1826_v5 = vpop.f32.mrb[1].mxu1 }
 0x104   : > { %v1755_v6 = vadd.f32 %v1754_v4, %v1753_v2  ;;  %v2346_v7 = vadd.f32 %v1826_v5, %v1825_v3  ;;  %v1756_v8 = vpop.f32.mrb[2].mxu0  ;;  %v1828_v9 = vpop.f32.mrb[2].mxu1 }
 0x105   : > { %v1757_v10 = vpop.f32.mrb[3].mxu0  ;;  %v1829_v11 = vpop.f32.mrb[3].mxu1 }
 0x106   : > { %v1758_v12 = vadd.f32 %v1757_v10, %v1756_v8  ;;  %v2348_v13 = vadd.f32 %v1829_v11, %v1828_v9 }
 0x10a   : > { %v1759_v14 = vpop.f32.mrb[4].mxu0  ;;  %v1831_v15 = vpop.f32.mrb[4].mxu1 }
 0x10b   : > { %v1760_v16 = vpop.f32.mrb[5].mxu0  ;;  %v1832_v17 = vpop.f32.mrb[5].mxu1 }
 0x10c   : > { %v1761_v18 = vadd.f32 %v1760_v16, %v1759_v14  ;;  %v2350_v19 = vadd.f32 %v1832_v17, %v1831_v15  ;;  %v1762_v20 = vpop.f32.mrb[6].mxu0  ;;  %v1834_v21 = vpop.f32.mrb[6].mxu1 }
 0x10d   : > { %v1763_v22 = vpop.f32.mrb[7].mxu0  ;;  %v1835_v23 = vpop.f32.mrb[7].mxu1 }
 0x10e   : > { %v1764_v24 = vadd.f32 %v1763_v22, %v1762_v20  ;;  %v2352_v25 = vadd.f32 %v1835_v23, %v1834_v21 }
 0x112   : > { %v1765_v26 = vpop.f32.mrb[8].mxu0  ;;  %v1837_v27 = vpop.f32.mrb[8].mxu1 }
 0x113   : > { %v1766_v28 = vpop.f32.mrb[9].mxu0  ;;  %v1838_v29 = vpop.f32.mrb[9].mxu1 }
 0x114   : > { %v1767_v30 = vadd.f32 %v1766_v28, %v1765_v26  ;;  %v2354_v31 = vadd.f32 %v1838_v29, %v1837_v27  ;;  %v1768_v32 = vpop.f32.mrb[10].mxu0  ;;  %v1840_v33 = vpop.f32.mrb[10].mxu1 }
 0x115   : > { %v1769_v34 = vpop.f32.mrb[11].mxu0  ;;  %v1841_v35 = vpop.f32.mrb[11].mxu1 }
 0x116   : > { %v1770_v36 = vadd.f32 %v1769_v34, %v1768_v32  ;;  %v2356_v37 = vadd.f32 %v1841_v35, %v1840_v33 }
 0x11a   : > { %v1771_v38 = vpop.f32.mrb[12].mxu0  ;;  %v1843_v39 = vpop.f32.mrb[12].mxu1 }
 0x11b   : > { %v1772_v40 = vpop.f32.mrb[13].mxu0  ;;  %v1844_v41 = vpop.f32.mrb[13].mxu1 }
 0x11c   : > { %v1773_v42 = vadd.f32 %v1772_v40, %v1771_v38  ;;  %v2358_v43 = vadd.f32 %v1844_v41, %v1843_v39  ;;  %v1774_v44 = vpop.f32.mrb[14].mxu0  ;;  %v1846_v45 = vpop.f32.mrb[14].mxu1 }
 0x11d   : > { %v1775_v46 = vpop.f32.mrb[15].mxu0  ;;  %v1847_v47 = vpop.f32.mrb[15].mxu1 }
 0x11e   : > { %v1776_v48 = vadd.f32 %v1775_v46, %v1774_v44  ;;  %v2360_v49 = vadd.f32 %v1847_v47, %v1846_v45 }
 0x122   : > { %v1777_v50 = vpop.f32.mrb[16].mxu0  ;;  %v1873_v51 = vpop.f32.mrb[16].mxu1 }
 0x123   : > { %v963_v53 = vadd.f32 %v1873_v51, %v1761_v18  ;;  %v1778_v54 = vpop.f32.mrb[17].mxu0  ;;  %v954_v55 = vpop.f32.mrb[17].mxu1 }
 0x124   : > { %v1779_v57 = vadd.f32 %v1778_v54, %v1777_v50  ;;  %v955_v58 = vadd.f32 %v1755_v6, %v954_v55  ;;  %v1780_v59 = vpop.f32.mrb[18].mxu0  ;;  %v1874_v60 = vpop.f32.mrb[18].mxu1 }
 0x125   : > { %v1090_v61 = vmul.f32 %v2365_v52, %v963_v53  ;;  %v966_v62 = vadd.f32 %v1874_v60, %v1764_v24  ;;  %v1781_v63 = vpop.f32.mrb[19].mxu0  ;;  %v957_v0 = vpop.f32.mrb[19].mxu1 }
 0x126   : > { %v1088_v1 = vmul.f32 %v2365_v52, %v955_v58  ;;  %v1782_v2 = vadd.f32 %v1781_v63, %v1780_v59  ;;  %v958_v3 = vadd.f32 %v1758_v12, %v957_v0 }
 0x127   : > { %v1129_v4 = vadd.f32 %v2370_v56, %v1090_v61  ;;  %v1091_v5 = vmul.f32 %v2365_v52, %v966_v62 }
 0x128   : > { %v1127_v8 = vadd.f32 %v2370_v56, %v1088_v1  ;;  %v1089_v6 = vmul.f32 %v2365_v52, %v958_v3 }
 0x129   : > { %v1130_v9 = vadd.f32 %v2370_v56, %v1091_v5  ;;  %v1161_v15 = vmax.f32 %v1129_v4, 0.0 }
 0x12a   : > { %v1128_v10 = vadd.f32 %v2370_v56, %v1089_v6  ;;  %v1783_v11 = vpop.f32.mrb[20].mxu0  ;;  %v1877_v14 = vpop.f32.mrb[20].mxu1  ;;  %v1159_v20 = vmax.f32 %v1127_v8, 0.0 }
 0x12b   : > { %v1162_v16 = vmax.f32 %v1130_v9, 0.0  ;;  %v979_v17 = vadd.f32 %v1877_v14, %v1773_v42  ;;  %v1784_v12 = vpop.f32.mrb[21].mxu0  ;;  %v970_v18 = vpop.f32.mrb[21].mxu1 }
 0x12c   : > { %v1160_v21 = vmax.f32 %v1128_v10, 0.0  ;;  %v1785_v22 = vadd.f32 %v1784_v12, %v1783_v11  ;;  %v971_v23 = vadd.f32 %v1767_v30, %v970_v18  ;;  %v1786_v24 = vpop.f32.mrb[22].mxu0  ;;  %v1878_v26 = vpop.f32.mrb[22].mxu1 }
 0x12d   : > { %v1650_v27 = vpack.c.bf16 %v1162_v16, %v1161_v15  ;;  %v1094_v28 = vmul.f32 %v2365_v52, %v979_v17  ;;  %v982_v29 = vadd.f32 %v1878_v26, %v1776_v48  ;;  %v1787_v32 = vpop.f32.mrb[23].mxu0  ;;  %v973_v33 = vpop.f32.mrb[23].mxu1 }
 0x12e   : > { %v1645_v34 = vpack.c.bf16 %v1160_v21, %v1159_v20  ;;  %v1092_v35 = vmul.f32 %v2365_v52, %v971_v23  ;;  %v1788_v38 = vadd.f32 %v1787_v32, %v1786_v24  ;;  %v974_v39 = vadd.f32 %v1770_v36, %v973_v33 }
 0x12f   : > { %1722 = vst [vmem:[%s2385_s26 + $0x8] sm:$0xff] %v1650_v27   ;;  %v1133_v30 = vadd.f32 %v2370_v56, %v1094_v28  ;;  %v1095_v40 = vmul.f32 %v2365_v52, %v982_v29 }
 0x130   : > { %1646 = vst [vmem:[%s2385_s26] sm:$0xff] %v1645_v34   ;;  %v1131_v41 = vadd.f32 %v2370_v56, %v1092_v35  ;;  %v1093_v42 = vmul.f32 %v2365_v52, %v974_v39 }
 0x131   : > { %v1134_v44 = vadd.f32 %v2370_v56, %v1095_v40  ;;  %v1165_v47 = vmax.f32 %v1133_v30, 0.0 }
 0x132   : > { %v1132_v45 = vadd.f32 %v2370_v56, %v1093_v42  ;;  %v1789_v46 = vpop.f32.mrb[24].mxu0  ;;  %v1881_v36 = vpop.f32.mrb[24].mxu1  ;;  %v1163_v54 = vmax.f32 %v1131_v41, 0.0 }
 0x133   : > { %v1166_v48 = vmax.f32 %v1134_v44, 0.0  ;;  %v995_v50 = vadd.f32 %v1881_v36, %v1785_v22  ;;  %v1790_v51 = vpop.f32.mrb[25].mxu0  ;;  %v986_v53 = vpop.f32.mrb[25].mxu1 }
 0x134   : > { %v1164_v55 = vmax.f32 %v1132_v45, 0.0  ;;  %v1791_v58 = vadd.f32 %v1790_v51, %v1789_v46  ;;  %v987_v59 = vadd.f32 %v1779_v57, %v986_v53  ;;  %v1792_v60 = vpop.f32.mrb[26].mxu0  ;;  %v1882_v61 = vpop.f32.mrb[26].mxu1 }
 0x135   : > { %v1660_v62 = vpack.c.bf16 %v1166_v48, %v1165_v47  ;;  %v1098_v63 = vmul.f32 %v2365_v52, %v995_v50  ;;  %v998_v0 = vadd.f32 %v1882_v61, %v1788_v38  ;;  %v1793_v1 = vpop.f32.mrb[27].mxu0  ;;  %v989_v3 = vpop.f32.mrb[27].mxu1 }
 0x136   : > { %v1655_v4 = vpack.c.bf16 %v1164_v55, %v1163_v54  ;;  %v1096_v5 = vmul.f32 %v2365_v52, %v987_v59  ;;  %v1794_v8 = vadd.f32 %v1793_v1, %v1792_v60  ;;  %v990_v6 = vadd.f32 %v1782_v2, %v989_v3 }
 0x137   : > { %1724 = vst [vmem:[%s2385_s26 + $0x18] sm:$0xff] %v1660_v62   ;;  %v1137_v9 = vadd.f32 %v2370_v56, %v1098_v63  ;;  %v1099_v10 = vmul.f32 %v2365_v52, %v998_v0 }
 0x138   : > { %1723 = vst [vmem:[%s2385_s26 + $0x10] sm:$0xff] %v1655_v4   ;;  %v1135_v57 = vadd.f32 %v2370_v56, %v1096_v5  ;;  %v1097_v11 = vmul.f32 %v2365_v52, %v990_v6 }
 0x139   : > { %v1138_v14 = vadd.f32 %v2370_v56, %v1099_v10  ;;  %v1169_v12 = vmax.f32 %v1137_v9, 0.0 }
 0x13a   : > { %v1136_v15 = vadd.f32 %v2370_v56, %v1097_v11  ;;  %v1795_v16 = vpop.f32.mrb[28].mxu0  ;;  %v1885_v17 = vpop.f32.mrb[28].mxu1  ;;  %v1167_v21 = vmax.f32 %v1135_v57, 0.0 }
 0x13b   : > { %v1170_v18 = vmax.f32 %v1138_v14, 0.0  ;;  %v1796_v2 = vpop.f32.mrb[29].mxu0  ;;  %v1002_v20 = vpop.f32.mrb[29].mxu1 }
 0x13c   : > { %v1168_v22 = vmax.f32 %v1136_v15, 0.0  ;;  %v1797_v23 = vadd.f32 %v1796_v2, %v1795_v16  ;;  %v1003_v24 = vadd.f32 %v1791_v58, %v1002_v20  ;;  %v1798_v26 = vpop.f32.mrb[30].mxu0  ;;  %v1886_v27 = vpop.f32.mrb[30].mxu1 }
 0x13d   : > { %v1670_v28 = vpack.c.bf16 %v1170_v18, %v1169_v12  ;;  %v1799_v29 = vpop.f32.mrb[31].mxu0  ;;  %v1005_v32 = vpop.f32.mrb[31].mxu1 }
 0x13e   : > { %v1665_v33 = vpack.c.bf16 %v1168_v22, %v1167_v21  ;;  %v1011_v34 = vadd.f32 %v1885_v17, %v1797_v23  ;;  %v1100_v35 = vmul.f32 %v2365_v52, %v1003_v24  ;;  %v1800_v38 = vadd.f32 %v1799_v29, %v1798_v26 }
 0x13f   : > { %1726 = vst [vmem:[%s2385_s26 + $0x28] sm:$0xff] %v1670_v28   ;;  %v1006_v39 = vadd.f32 %v1794_v8, %v1005_v32 }
 0x140   : > { %1725 = vst [vmem:[%s2385_s26 + $0x20] sm:$0xff] %v1665_v33   ;;  %v1102_v30 = vmul.f32 %v2365_v52, %v1011_v34  ;;  %v1014_v40 = vadd.f32 %v1886_v27, %v1800_v38  ;;  %v1139_v41 = vadd.f32 %v2370_v56, %v1100_v35 }
 0x141   : > { %v1101_v42 = vmul.f32 %v2365_v52, %v1006_v39 }
 0x142   : > { %v1141_v44 = vadd.f32 %v2370_v56, %v1102_v30  ;;  %v1103_v45 = vmul.f32 %v2365_v52, %v1014_v40  ;;  %v1801_v46 = vpop.f32.mrb[32].mxu0  ;;  %v1889_v36 = vpop.f32.mrb[32].mxu1  ;;  %v1171_v58 = vmax.f32 %v1139_v41, 0.0 }
 0x143   : > { %v1140_v47 = vadd.f32 %v2370_v56, %v1101_v42  ;;  %v1802_v48 = vpop.f32.mrb[33].mxu0  ;;  %v1018_v50 = vpop.f32.mrb[33].mxu1 }
 0x144   : > { %v1142_v51 = vadd.f32 %v2370_v56, %v1103_v45  ;;  %v1803_v53 = vadd.f32 %v1802_v48, %v1801_v46  ;;  %v1804_v54 = vpop.f32.mrb[34].mxu0  ;;  %v1890_v55 = vpop.f32.mrb[34].mxu1  ;;  %v1173_v62 = vmax.f32 %v1141_v44, 0.0 }
 0x145   : > { %v1172_v59 = vmax.f32 %v1140_v47, 0.0  ;;  %v1805_v60 = vpop.f32.mrb[35].mxu0  ;;  %v1021_v61 = vpop.f32.mrb[35].mxu1 }
 0x146   : > { %v1174_v63 = vmax.f32 %v1142_v51, 0.0  ;;  %v1019_v0 = vadd.f32 %v1803_v53, %v1018_v50  ;;  %v1806_v1 = vadd.f32 %v1805_v60, %v1804_v54 }
 0x147   : > { %v1675_v3 = vpack.c.bf16 %v1172_v59, %v1171_v58 }
 0x148   : > { %v1680_v4 = vpack.c.bf16 %v1174_v63, %v1173_v62  ;;  %v1104_v5 = vmul.f32 %v2365_v52, %v1019_v0  ;;  %v1022_v8 = vadd.f32 %v1806_v1, %v1021_v61 }
 0x149   : > { %1727 = vst [vmem:[%s2385_s26 + $0x30] sm:$0xff] %v1675_v3  }
 0x14a   : > { %1728 = vst [vmem:[%s2385_s26 + $0x38] sm:$0xff] %v1680_v4   ;;  %v1143_v6 = vadd.f32 %v2370_v56, %v1104_v5  ;;  %v1105_v9 = vmul.f32 %v2365_v52, %v1022_v8  ;;  %v1807_v10 = vpop.f32.mrb[36].mxu0  ;;  %v2420_v57 = vpop.f32.mrb[36].mxu1 }
 0x14b   : > { %v1808_v11 = vpop.f32.mrb[37].mxu0  ;;  %v1034_v14 = vpop.f32.mrb[37].mxu1 }
 0x14c   : > { %v1144_v15 = vadd.f32 %v2370_v56, %v1105_v9  ;;  %v1809_v16 = vadd.f32 %v1808_v11, %v1807_v10  ;;  %v1810_v17 = vpop.f32.mrb[38].mxu0  ;;  %v2423_v12 = vpop.f32.mrb[38].mxu1  ;;  %v1175_v20 = vmax.f32 %v1143_v6, 0.0 }
 0x14d   : > { %v1811_v18 = vpop.f32.mrb[39].mxu0  ;;  %v1037_v2 = vpop.f32.mrb[39].mxu1 }
 0x14e   : > { %v1176_v21 = vmax.f32 %v1144_v15, 0.0  ;;  %v1027_v22 = vadd.f32 %v1889_v36, %v1809_v16  ;;  %v1812_v23 = vadd.f32 %v1811_v18, %v1810_v17 }
 0x150   : > { %v1685_v24 = vpack.c.bf16 %v1176_v21, %v1175_v20  ;;  %v1106_v26 = vmul.f32 %v2365_v52, %v1027_v22  ;;  %v1030_v27 = vadd.f32 %v1890_v55, %v1812_v23 }
 0x152   : > { %1729 = vst [vmem:[%s2385_s26 + $0x40] sm:$0xff] %v1685_v24   ;;  %v1145_v28 = vadd.f32 %v2370_v56, %v1106_v26  ;;  %v1107_v29 = vmul.f32 %v2365_v52, %v1030_v27  ;;  %v1813_v32 = vpop.f32.mrb[40].mxu0  ;;  %v1897_v33 = vpop.f32.mrb[40].mxu1 }
 0x153   : > { %v1059_v34 = vadd.f32 %v1897_v33, %v2350_v19  ;;  %v1814_v35 = vpop.f32.mrb[41].mxu0  ;;  %v1050_v38 = vpop.f32.mrb[41].mxu1 }
 0x154   : > { %v1146_v39 = vadd.f32 %v2370_v56, %v1107_v29  ;;  %v1815_v30 = vadd.f32 %v1814_v35, %v1813_v32  ;;  %v1051_v40 = vadd.f32 %v2346_v7, %v1050_v38  ;;  %v1816_v41 = vpop.f32.mrb[42].mxu0  ;;  %v1898_v42 = vpop.f32.mrb[42].mxu1  ;;  %v1177_v44 = vmax.f32 %v1145_v28, 0.0 }
 0x155   : > { %v1114_v45 = vmul.f32 %v2365_v52, %v1059_v34  ;;  %v1062_v46 = vadd.f32 %v1898_v42, %v2352_v25  ;;  %v1817_v36 = vpop.f32.mrb[43].mxu0  ;;  %v1053_v47 = vpop.f32.mrb[43].mxu1 }
 0x156   : > { %v1178_v48 = vmax.f32 %v1146_v39, 0.0  ;;  %v1035_v50 = vadd.f32 %v1815_v30, %v1034_v14  ;;  %v1112_v19 = vmul.f32 %v2365_v52, %v1051_v40  ;;  %v1818_v51 = vadd.f32 %v1817_v36, %v1816_v41 }
 0x157   : > { %v1153_v53 = vadd.f32 %v2370_v56, %v1114_v45  ;;  %v1115_v54 = vmul.f32 %v2365_v52, %v1062_v46  ;;  %v1054_v7 = vadd.f32 %v2348_v13, %v1053_v47 }
 0x158   : > { %v1690_v55 = vpack.c.bf16 %v1178_v48, %v1177_v44  ;;  %v1108_v58 = vmul.f32 %v2365_v52, %v1035_v50  ;;  %v1151_v59 = vadd.f32 %v2370_v56, %v1112_v19  ;;  %v1038_v25 = vadd.f32 %v1818_v51, %v1037_v2 }
 0x159   : > { %v1154_v60 = vadd.f32 %v2370_v56, %v1115_v54  ;;  %v1113_v61 = vmul.f32 %v2365_v52, %v1054_v7  ;;  %v1185_v62 = vmax.f32 %v1153_v53, 0.0 }
 0x15a   : > { %1730 = vst [vmem:[%s2385_s26 + $0x48] sm:$0xff] %v1690_v55   ;;  %v1147_v63 = vadd.f32 %v2370_v56, %v1108_v58  ;;  %v1109_v0 = vmul.f32 %v2365_v52, %v1038_v25  ;;  %v1819_v1 = vpop.f32.mrb[44].mxu0  ;;  %v1901_v3 = vpop.f32.mrb[44].mxu1  ;;  %v1183_v4 = vmax.f32 %v1151_v59, 0.0 }
 0x15b   : > { %v1186_v13 = vmax.f32 %v1154_v60, 0.0  ;;  %v1152_v5 = vadd.f32 %v2370_v56, %v1113_v61  ;;  %v1075_v8 = vadd.f32 %v1901_v3, %v2358_v43  ;;  %v1820_v6 = vpop.f32.mrb[45].mxu0  ;;  %v1066_v9 = vpop.f32.mrb[45].mxu1 }
 0x15c   : > { %v1179_v10 = vmax.f32 %v1147_v63, 0.0  ;;  %v1148_v11 = vadd.f32 %v2370_v56, %v1109_v0  ;;  %v1821_v14 = vadd.f32 %v1820_v6, %v1819_v1  ;;  %v1067_v15 = vadd.f32 %v2354_v31, %v1066_v9  ;;  %v1822_v16 = vpop.f32.mrb[46].mxu0  ;;  %v1902_v17 = vpop.f32.mrb[46].mxu1 }
 0x15d   : > { %v1710_v18 = vpack.c.bf16 %v1186_v13, %v1185_v62  ;;  %v1184_v2 = vmax.f32 %v1152_v5, 0.0  ;;  %v1118_v20 = vmul.f32 %v2365_v52, %v1075_v8  ;;  %v1078_v21 = vadd.f32 %v1902_v17, %v2360_v49  ;;  %v1823_v22 = vpop.f32.mrb[47].mxu0  ;;  %v1069_v43 = vpop.f32.mrb[47].mxu1 }
 0x15e   : > { %v1180_v23 = vmax.f32 %v1148_v11, 0.0  ;;  %v1043_v24 = vadd.f32 %v2420_v57, %v1821_v14  ;;  %v1116_v26 = vmul.f32 %v2365_v52, %v1067_v15  ;;  %v1824_v27 = vadd.f32 %v1823_v22, %v1822_v16 }
 0x15f   : > { %1734 = vst [vmem:[%s2385_s26 + $0x68] sm:$0xff] %v1710_v18   ;;  %v1705_v31 = vpack.c.bf16 %v1184_v2, %v1183_v4  ;;  %v1157_v28 = vadd.f32 %v2370_v56, %v1118_v20  ;;  %v1119_v29 = vmul.f32 %v2365_v52, %v1078_v21  ;;  %v1070_v32 = vadd.f32 %v2356_v37, %v1069_v43 }
 0x160   : > { %v1695_v49 = vpack.c.bf16 %v1180_v23, %v1179_v10  ;;  %v1110_v33 = vmul.f32 %v2365_v52, %v1043_v24  ;;  %v1046_v34 = vadd.f32 %v2423_v12, %v1824_v27  ;;  %v1155_v57 = vadd.f32 %v2370_v56, %v1116_v26 }
 0x161   : > { %1733 = vst [vmem:[%s2385_s26 + $0x60] sm:$0xff] %v1705_v31   ;;  %v1158_v35 = vadd.f32 %v2370_v56, %v1119_v29  ;;  %v1117_v38 = vmul.f32 %v2365_v52, %v1070_v32  ;;  %v1189_v37 = vmax.f32 %v1157_v28, 0.0 }
 0x162   : > { %1731 = vst [vmem:[%s2385_s26 + $0x50] sm:$0xff] %v1695_v49   ;;  %v1149_v39 = vadd.f32 %v2370_v56, %v1110_v33  ;;  %v1111_v30 = vmul.f32 %v2365_v52, %v1046_v34  ;;  %v1187_v42 = vmax.f32 %v1155_v57, 0.0 }
 0x163   : > { %v1190_v40 = vmax.f32 %v1158_v35, 0.0  ;;  %v1156_v41 = vadd.f32 %v2370_v56, %v1117_v38 }
 0x164   : > { %v1150_v12 = vadd.f32 %v2370_v56, %v1111_v30  ;;  %v1181_v46 = vmax.f32 %v1149_v39, 0.0 }
 0x165   : > { %v1720_v44 = vpack.c.bf16 %v1190_v40, %v1189_v37  ;;  %v1188_v45 = vmax.f32 %v1156_v41, 0.0 }
 0x166   : > { %v1182_v36 = vmax.f32 %v1150_v12, 0.0 }
 0x167   : > { %1736 = vst [vmem:[%s2385_s26 + $0x78] sm:$0xff] %v1720_v44   ;;  %v1715_v47 = vpack.c.bf16 %v1188_v45, %v1187_v42 }
 0x168   : > { %v1700_v52 = vpack.c.bf16 %v1182_v36, %v1181_v46 }
 0x169   : > { %1735 = vst [vmem:[%s2385_s26 + $0x70] sm:$0xff] %v1715_v47  }
 0x16a   : > { %1732 = vst [vmem:[%s2385_s26 + $0x58] sm:$0xff] %v1700_v52  }
 0x16b   : > { %2072 = shalt.err (!%p2069_p5)
}
 0x16c   : > { %s2073_s10 = scalar_lea.hbm %s2474_s8, 2048  ;;  %s2077_s21 = scalar_lea.hbm %s2532_s4, 4096 }
 0x16d   : > { %p2074_p6 = scmp.ne.s32.totalorder %s2474_s8, %s2073_s10  ;;  %p2078_p10 = scmp.lt.u32.totalorder %s2474_s8, %s2532_s4 }
 0x16e   : > { %p2079_p11 = scmp.lt.u32.totalorder %s2077_s21, %s2073_s10  ;;  %p2081_p13 = scmp.lt.u32.totalorder %s2073_s10, %s2474_s8 }
 0x16f   : > { %p2075_p7 = pnand %p2074_p6, %p2207_p4 }
 0x170   : > { %p2080_p12 = por %p2079_p11, %p2078_p10 }
 0x171   : > { %p2076_p9 = pneg %p2075_p7 }
 0x172   : > { %p2082_p0 = por %p2081_p13, %p2080_p12 }
 0x174   : > { %p2083_p1 = pnand %p2082_p0, %p2076_p9 }
 0x176   : > { %2086 = shalt.err (!%p2083_p1)
}
 0x177   : > { %s2140_s26 = smov 64   ;;  %s2141_s29 = smov 4  }
 0x178   : > { %1920 = dma.vmem_to_hbm [thread:$0]  (%p2207_p4), %s2476_s30, 2048, %s2474_s8, %s2482_s18, %s2140_s26, %s2140_s26, %s2141_s29  }
 0x179 PF: > { %p1926_p2 = scmp.ge.s32.totalorder %s2137_s20, 2  ;;  %s1381_s6 = sand.u32 1, %s2117_s15  }
 0x17a   : > { %s1382_s7 = scalar_lea.sflag [#allocation3], %s1381_s6 }
 0x17b   : > { %p1923_p3 = pnand %p1926_p2, %p2214_p8 }
 0x17d   : > { %2112 = dma.done.wait (!%p1923_p3), %s1382_s7, 2048  }
 0x17e   : > { %2114 = vsyncadd (!%p1923_p3), %s1382_s7, 4294965248  ;;  %s17_s20 = sadd.s32 1, %s2137_s20   ;;  %s2535_s15 = smov %s2121_s16 }
 0x17f   : > { %p14_p5 = scmp.ge.s32.totalorder %s17_s20, 4   ;;  %s2536_s16 = smov %s2125_s17 }
 0x180   : > { %s2537_s17 = smov %s2220_s28  ;;  %s2538_s18 = smov %s2133_s19 }
 0x181   : > { %s2539_s19 = smov %s2541_s23  ;;  %16 = sbr.rel (!%p14_p5) target bundleno = 4 (0x4), region = 80 }
 0x188   :  { %1387 = vsyncpa [#allocation3], 1 }
 0x189   :  { %1389 = vsyncpa [#allocation3 + $0x1], 1 }

</bundles_post_ra>
